<compile_context>
chip_gen: v7x
topology: tpu7x:2x2x1
jax: 0.10.0
libtpu: 0.0.40
codegen_flags: <defaults>
</compile_context>

<pallas_src>
import functools

import jax
import jax.numpy as jnp
from jax import lax
from jax.experimental import pallas as pl
from jax.experimental.pallas import tpu as pltpu

n_embed = 384     # matches the PyTorch module's global
block_size = 256  # matches the PyTorch module's global

_NEG_INF = -1e30  # large finite negative: avoids any inf-inf NaN pitfalls


# ---------------------------------------------------------------------------
# Pass 1: fused Q/K/V projection (each K/V tile projected exactly once).
# ---------------------------------------------------------------------------
def _qkv_proj_kernel(x_ref, w_ref, q_ref, k_ref, v_ref, *, head_size):
    x = x_ref[...]                                           # (blk, C) bf16
    qkv = jnp.dot(x, w_ref[...],
                  preferred_element_type=jnp.float32)        # (blk, 3H) f32, MXU
    h = head_size
    # scale is already folded into the query columns of w_ref
    q_ref[...] = qkv[:, :h].astype(q_ref.dtype)
    k_ref[...] = qkv[:, h:2 * h].astype(k_ref.dtype)
    v_ref[...] = qkv[:, 2 * h:].astype(v_ref.dtype)


def _qkv_project(x_bf16, w_qkv_t, head_size, blk):
    B, T, C = x_bf16.shape
    n_t = T // blk
    h3 = w_qkv_t.shape[1]
    kernel = functools.partial(_qkv_proj_kernel, head_size=head_size)
    out_sds = jax.ShapeDtypeStruct((B, T, head_size), jnp.bfloat16)
    return pl.pallas_call(
        kernel,
        out_shape=(out_sds, out_sds, out_sds),
        grid_spec=pltpu.PrefetchScalarGridSpec(
            num_scalar_prefetch=0,
            grid=(B, n_t),
            in_specs=[
                pl.BlockSpec((pl.Squeezed(), blk, C), lambda b, i: (b, i, 0)),
                pl.BlockSpec((C, h3), lambda b, i: (0, 0)),   # resident weights
            ],
            out_specs=[
                pl.BlockSpec((pl.Squeezed(), blk, head_size), lambda b, i: (b, i, 0)),
                pl.BlockSpec((pl.Squeezed(), blk, head_size), lambda b, i: (b, i, 0)),
                pl.BlockSpec((pl.Squeezed(), blk, head_size), lambda b, i: (b, i, 0)),
            ],
        ),
        compiler_params=pltpu.CompilerParams(
            dimension_semantics=("parallel", "parallel"),
        ),
    )(x_bf16, w_qkv_t)


# ---------------------------------------------------------------------------
# Pass 2: flash attention (online softmax, causal tile skip).
# ---------------------------------------------------------------------------
def _flash_kernel(q_ref, k_ref, v_ref, o_ref, m_sc, l_sc, acc_sc, *, blk):
    qi = pl.program_id(1)   # query-tile index
    ki = pl.program_id(2)   # kv-tile index (reduction axis)

    @pl.when(ki == 0)
    def _():
        m_sc[...] = jnp.full_like(m_sc, _NEG_INF)
        l_sc[...] = jnp.zeros_like(l_sc)
        acc_sc[...] = jnp.zeros_like(acc_sc)

    def _scores():
        # contract the head dims directly (q, k are (blk, H) bf16)
        return lax.dot_general(q_ref[...], k_ref[...],
                               (((1,), (1,)), ((), ())),
                               preferred_element_type=jnp.float32)  # (blk, blk)

    def _online_update(s):
        m_prev = m_sc[...]                                          # (blk, 1)
        m_new = jnp.maximum(m_prev, jnp.max(s, axis=-1, keepdims=True))
        alpha = jnp.exp(m_prev - m_new)
        p = jnp.exp(s - m_new)                                      # (blk, blk)
        l_sc[...] = alpha * l_sc[...] + jnp.sum(p, axis=-1, keepdims=True)
        acc_sc[...] = alpha * acc_sc[...] + jnp.dot(
            p.astype(jnp.bfloat16), v_ref[...],
            preferred_element_type=jnp.float32)
        m_sc[...] = m_new

    # interior tiles (strictly below the diagonal): no causal masking needed
    @pl.when(ki < qi)
    def _():
        _online_update(_scores())

    # diagonal tile: mask with local iotas (global offsets cancel), update,
    # then finalize -- this is the last unmasked kv tile for this query tile.
    @pl.when(ki == qi)
    def _():
        s = _scores()
        row = lax.broadcasted_iota(jnp.int32, (blk, blk), 0)
        col = lax.broadcasted_iota(jnp.int32, (blk, blk), 1)
        s = jnp.where(col <= row, s, _NEG_INF)
        _online_update(s)
        inv_l = pl.reciprocal(l_sc[...], approx=True)               # EUP, not VALU
        o_ref[...] = (acc_sc[...] * inv_l).astype(o_ref.dtype)


def head_forward(x, w_key, w_query, w_value, *, block_q=128):
    """x: (B, T, C);  w_*: (H, C) — PyTorch nn.Linear weight layout."""
    B, T, C = x.shape
    H = w_key.shape[0]
    scale = float(C) ** -0.5

    # square tiles so "kv tile index > q tile index" <=> fully masked
    blk = block_q if T % block_q == 0 else T
    n_t = T // blk

    # bf16 MXU inputs (f32 accumulation inside the kernels)
    xb = x.astype(jnp.bfloat16)
    # fused weight, scale folded into the query rows, transposed once to (C, 3H)
    # so every in-kernel matmul is a plain (M,K)x(K,N) with no transpose.
    w_qkv_t = jnp.concatenate([w_query * scale, w_key, w_value],
                              axis=0).T.astype(jnp.bfloat16)        # (C, 3H)

    q, k, v = _qkv_project(xb, w_qkv_t, H, blk)

    kernel = functools.partial(_flash_kernel, blk=blk)

    return pl.pallas_call(
        kernel,
        out_shape=jax.ShapeDtypeStruct((B, T, H), x.dtype),
        grid_spec=pltpu.PrefetchScalarGridSpec(
            num_scalar_prefetch=0,
            grid=(B, n_t, n_t),
            in_specs=[
                # q tile: constant across the kv axis -> stays resident
                pl.BlockSpec((pl.Squeezed(), blk, H),
                             lambda b, qi, ki: (b, qi, 0)),
                # k / v tiles: clamp ki so fully-masked tiles (ki > qi) reuse
                # the resident block instead of issuing a wasted DMA.
                pl.BlockSpec((pl.Squeezed(), blk, H),
                             lambda b, qi, ki: (b, jnp.minimum(ki, qi), 0)),
                pl.BlockSpec((pl.Squeezed(), blk, H),
                             lambda b, qi, ki: (b, jnp.minimum(ki, qi), 0)),
            ],
            out_specs=pl.BlockSpec((pl.Squeezed(), blk, H),
                                   lambda b, qi, ki: (b, qi, 0)),
            scratch_shapes=[
                pltpu.VMEM((blk, 1), jnp.float32),    # running row max
                pltpu.VMEM((blk, 1), jnp.float32),    # running row denom
                pltpu.VMEM((blk, H), jnp.float32),    # output accumulator
            ],
        ),
        compiler_params=pltpu.CompilerParams(
            dimension_semantics=("parallel", "parallel", "arbitrary"),
        ),
    )(q, k, v)


def head_reference(x, w_key, w_query, w_value):
    """Pure-JAX (f32) reference mirroring the PyTorch forward (eval mode)."""
    B, T, C = x.shape
    k = x @ w_key.T
    q = x @ w_query.T
    v = x @ w_value.T
    wei = (q @ jnp.swapaxes(k, -2, -1)) * (C ** -0.5)
    mask = jnp.tril(jnp.ones((T, T), dtype=bool))
    wei = jnp.where(mask, wei, -jnp.inf)
    wei = jax.nn.softmax(wei, axis=-1)
    return wei @ v


if __name__ == "__main__":
    B, T, C = 2, block_size, n_embed   # (2, 256, 384) — T = block_size of the module
    head_size = 64

    key = jax.random.PRNGKey(0)
    kx, kk, kq, kv = jax.random.split(key, 4)

    x = jax.random.normal(kx, (B, T, C), dtype=jnp.float32)
    # nn.Linear(n_embed, head_size, bias=False) -> weight shape (head_size, n_embed)
    bound = 1.0 / (C ** 0.5)
    w_key = jax.random.uniform(kk, (head_size, C), jnp.float32, -bound, bound)
    w_query = jax.random.uniform(kq, (head_size, C), jnp.float32, -bound, bound)
    w_value = jax.random.uniform(kv, (head_size, C), jnp.float32, -bound, bound)

    out = head_forward(x, w_key, w_query, w_value)
    out = jax.block_until_ready(out)

    ref = head_reference(x, w_key, w_query, w_value)
    assert out.shape == (B, T, head_size)
    # bf16 MXU inputs + approx reciprocal vs pure-f32 reference -> loose tolerance
    assert jnp.allclose(out, ref, atol=3e-2, rtol=3e-2), "mismatch vs reference"

    print("KERNEL_OK")
</pallas_src>

<mosaic_0001>
module attributes {stable_mosaic.version = 11 : i64} {
  func.func @_qkv_proj_kernel(%arg0: i32, %arg1: i32, %arg2: memref<1x128x384xbf16, #tpu.memory_space<vmem>>, %arg3: memref<384x192xbf16, #tpu.memory_space<vmem>>, %arg4: memref<1x128x64xbf16, #tpu.memory_space<vmem>>, %arg5: memref<1x128x64xbf16, #tpu.memory_space<vmem>>, %arg6: memref<1x128x64xbf16, #tpu.memory_space<vmem>>) attributes {dimension_semantics = [#tpu.dimension_semantics<parallel>, #tpu.dimension_semantics<parallel>], iteration_bounds = array<i64: 2, 2>, scalar_prefetch = 0 : i64, scratch_operands = 0 : i64, tpu.core_type = #tpu.core_type<tc>, window_params = [{transform_indices = @transform_0, window_bounds = array<i64: 1, 128, 384>}, {pipeline_mode = #tpu.pipeline_mode<synchronous>, transform_indices = @transform_1, window_bounds = array<i64: 384, 192>}, {transform_indices = @transform_2, window_bounds = array<i64: 1, 128, 64>}, {transform_indices = @transform_3, window_bounds = array<i64: 1, 128, 64>}, {transform_indices = @transform_4, window_bounds = array<i64: 1, 128, 64>}]} {
    %c0 = arith.constant 0 : index
    %c0_0 = arith.constant 0 : index
    %c0_1 = arith.constant 0 : index
    %0 = vector.load %arg2[%c0, %c0_0, %c0_1] : memref<1x128x384xbf16, #tpu.memory_space<vmem>>, vector<1x128x384xbf16>
    %1 = vector.shape_cast %0 : vector<1x128x384xbf16> to vector<128x384xbf16>
    %c0_2 = arith.constant 0 : index
    %c0_3 = arith.constant 0 : index
    %2 = vector.load %arg3[%c0_2, %c0_3] : memref<384x192xbf16, #tpu.memory_space<vmem>>, vector<384x192xbf16>
    %cst = arith.constant dense<0.000000e+00> : vector<128x192xf32>
    %3 = tpu.matmul %1, %2, %cst {dimension_numbers = #tpu.dot_dimension_numbers<[1], [0], [0], [1], [0, 0, 1, 1], [], []>} : vector<128x384xbf16>, vector<384x192xbf16>, vector<128x192xf32> -> vector<128x192xf32>
    %4 = vector.extract_strided_slice %3 {offsets = [0, 0], sizes = [128, 64], strides = [1, 1]} : vector<128x192xf32> to vector<128x64xf32>
    %5 = arith.truncf %4 : vector<128x64xf32> to vector<128x64xbf16>
    %c0_4 = arith.constant 0 : index
    %c0_5 = arith.constant 0 : index
    %c0_6 = arith.constant 0 : index
    %6 = vector.load %arg4[%c0_4, %c0_5, %c0_6] : memref<1x128x64xbf16, #tpu.memory_space<vmem>>, vector<1x128x64xbf16>
    %7 = vector.shape_cast %6 : vector<1x128x64xbf16> to vector<128x64xbf16>
    %8 = vector.shape_cast %5 : vector<128x64xbf16> to vector<1x128x64xbf16>
    tpu.vector_store %arg4[%c0_4, %c0_5, %c0_6], %8 {strides = array<i32>} : memref<1x128x64xbf16, #tpu.memory_space<vmem>>, vector<1x128x64xbf16>,
    %9 = vector.extract_strided_slice %3 {offsets = [0, 64], sizes = [128, 64], strides = [1, 1]} : vector<128x192xf32> to vector<128x64xf32>
    %10 = arith.truncf %9 : vector<128x64xf32> to vector<128x64xbf16>
    %c0_7 = arith.constant 0 : index
    %c0_8 = arith.constant 0 : index
    %c0_9 = arith.constant 0 : index
    %11 = vector.load %arg5[%c0_7, %c0_8, %c0_9] : memref<1x128x64xbf16, #tpu.memory_space<vmem>>, vector<1x128x64xbf16>
    %12 = vector.shape_cast %11 : vector<1x128x64xbf16> to vector<128x64xbf16>
    %13 = vector.shape_cast %10 : vector<128x64xbf16> to vector<1x128x64xbf16>
    tpu.vector_store %arg5[%c0_7, %c0_8, %c0_9], %13 {strides = array<i32>} : memref<1x128x64xbf16, #tpu.memory_space<vmem>>, vector<1x128x64xbf16>,
    %14 = vector.extract_strided_slice %3 {offsets = [0, 128], sizes = [128, 64], strides = [1, 1]} : vector<128x192xf32> to vector<128x64xf32>
    %15 = arith.truncf %14 : vector<128x64xf32> to vector<128x64xbf16>
    %c0_10 = arith.constant 0 : index
    %c0_11 = arith.constant 0 : index
    %c0_12 = arith.constant 0 : index
    %16 = vector.load %arg6[%c0_10, %c0_11, %c0_12] : memref<1x128x64xbf16, #tpu.memory_space<vmem>>, vector<1x128x64xbf16>
    %17 = vector.shape_cast %16 : vector<1x128x64xbf16> to vector<128x64xbf16>
    %18 = vector.shape_cast %15 : vector<128x64xbf16> to vector<1x128x64xbf16>
    tpu.vector_store %arg6[%c0_10, %c0_11, %c0_12], %18 {strides = array<i32>} : memref<1x128x64xbf16, #tpu.memory_space<vmem>>, vector<1x128x64xbf16>,
    return
  }
  func.func @transform_0(%arg0: i32, %arg1: i32) -> (i32, i32, i32) {
    %c0_i32 = arith.constant 0 : i32
    %c0_i32_0 = arith.constant 0 : i32
    return %arg0, %arg1, %c0_i32 : i32, i32, i32
  }
  func.func @transform_1(%arg0: i32, %arg1: i32) -> (i32, i32) {
    %c0_i32 = arith.constant 0 : i32
    %c0_i32_0 = arith.constant 0 : i32
    %c0_i32_1 = arith.constant 0 : i32
    return %c0_i32, %c0_i32_0 : i32, i32
  }
  func.func @transform_2(%arg0: i32, %arg1: i32) -> (i32, i32, i32) {
    %c0_i32 = arith.constant 0 : i32
    %c0_i32_0 = arith.constant 0 : i32
    return %arg0, %arg1, %c0_i32 : i32, i32, i32
  }
  func.func @transform_3(%arg0: i32, %arg1: i32) -> (i32, i32, i32) {
    %c0_i32 = arith.constant 0 : i32
    %c0_i32_0 = arith.constant 0 : i32
    return %arg0, %arg1, %c0_i32 : i32, i32, i32
  }
  func.func @transform_4(%arg0: i32, %arg1: i32) -> (i32, i32, i32) {
    %c0_i32 = arith.constant 0 : i32
    %c0_i32_0 = arith.constant 0 : i32
    return %arg0, %arg1, %c0_i32 : i32, i32, i32
  }
}

</mosaic_0001>

<bundles_post_ra>
// kernel: tpu_custom_call.1
= control target key start
LH: loop header
LB: loop body
LE: loop exit
PB: predicated region body
PF: predicated region fallthrough
CT: control target
= control target key end

     0   :  { %10 = vsyncpa [#allocation3], 0  ;;  %s2341_s0 = inlined_call_operand.hbm [shape: bf16[2,256,384], index: 0, kind: input, shape index: {}]   ;;  %s2342_s1 = inlined_call_operand.vmem [shape: bf16[384,192], index: 1, kind: input, shape index: {}]   ;;  %s2343_s2 = inlined_call_operand.vmem [shape: bf16[2,256,64], index: 2, kind: output, shape index: {0}]   ;;  %s2344_s3 = inlined_call_operand.vmem [shape: bf16[2,256,64], index: 3, kind: output, shape index: {1}]   ;;  %s2345_s4 = inlined_call_operand.vmem [shape: bf16[2,256,64], index: 4, kind: output, shape index: {2}]  }
   0x1   :  { %12 = vsyncpa [#allocation3 + $0x1], 0  ;;  %s1890_s15 = smov 0   ;;  %s1892_s16 = smov 0  }
   0x2   :  { %s1894_s17 = smov 0   ;;  %s1896_s18 = smov 0  }
   0x3   :  { %s1898_s19 = smov 0   ;;  %s1900_s20 = smov 0  }
   0x4   :  { %s1902_s21 = smov 0   ;;  %s1904_s22 = smov 0  }
   0x5 LB: > { %s1392_s23 = sadd.s32 4294967295, %s1858_s22   ;;  %s27_s24 = sadd.s32 1, %s1850_s20  ;;  %s1858_s22 = sphi %s1904_s22, %s18_s22   ;;  %s1854_s21 = sphi %s1902_s21, %s2355_s21   ;;  %s1850_s20 = sphi %s1900_s20, %s2354_s20   ;;  %s1846_s19 = sphi %s1898_s19, %s2353_s19   ;;  %s1842_s18 = sphi %s1896_s18, %s2352_s18   ;;  %s1838_s17 = sphi %s1894_s17, %s2351_s17   ;;  %s1834_s16 = sphi %s1892_s16, %s2350_s16   ;;  %s1830_s15 = sphi %s1890_s15, %s2349_s15  }
   0x6   : > { %p28_p0 = scmp.ge.s32.totalorder %s27_s24, 2  ;;  %s30_s25 = sadd.s32 1, %s1854_s21 }
   0x7   : > { %s39_s26 = sadd.s32 1, %s1838_s17  ;;  %p46_p1 = scmp.ne.s32.totalorder %s1838_s17, %s1834_s16 }
   0x8   : > { %s2357_s24 = smov (%p28_p0, %s27_s24), 0  ;;  %s2359_s25 = smov (!%p28_p0, %s30_s25), %s1854_s21 }
   0x9   : > { %s35_s27 = ssub.s32 %s1850_s20, %s2357_s24  ;;  %p47_p2 = scmp.eq.s32.totalorder %s1858_s22, 0 }
   0xa   : > { %p32_p3 = scmp.ge.s32.totalorder %s2359_s25, 2  ;;  %p52_p4 = scmp.ne.s32.totalorder %s1834_s16, %s1830_s15 }
   0xb   : > { %p48_p5 = por %p47_p2, %p46_p1  ;;  %p53_p6 = scmp.eq.s32.totalorder %s1392_s23, 0 }
   0xc   : > { %s2361_s25 = smov (%p32_p3, %s2359_s25), 0  ;;  %p1589_p8 = scmp.lt.s32.totalorder %s1858_s22, 4 }
   0xd   : > { %p1943_p7 = por %p53_p6, %p52_p4  ;;  %s34_s29 = ssub.s32 %s1854_s21, %s2361_s25 }
   0xe   : > { %s36_s30 = sor.u32 %s35_s27, %s34_s29  ;;  %s184_s5 = sand.u32 1, %s1838_s17  }
   0xf   : > { %p37_p9 = scmp.eq.s32.totalorder %s36_s30, 0  ;;  %s1579_s6 = smul.u32 192, %s184_s5 }
  0x10   : > { %p1951_p10 = pnand %p1589_p8, %p48_p5  ;;  %s1580_s9 = smul.u32 48, %s1850_s20 }
  0x11   : > { %s1956_s8 = scalar_select %p37_p9, %s1838_s17, %s39_s26  }
  0x12   : > { %s1581_s10 = smul.u32 96, %s1854_s21  ;;  %s188_s11 = scalar_lea.vmem [#allocation2], %s1579_s6 }
  0x13   : > { %s198_s12 = sshll.u32 %s188_s11, 4  ;;  %s1968_s26 = scalar_lea.sflag [#allocation3], %s184_s5  ;;  %s1960_s12 = int_to_ptr.vmem [resolvable:$true] %s198_s12 }
  0x14   : > { %s195_s13 = sadd.s32 %s1581_s10, %s1580_s9  ;;  %p1764_p13 = pneg %p1951_p10 }
  0x15   : > { %s1398_s14 = sshll.u32 %s195_s13, 6  ;;  %s1767_s9 = scalar_lea.hbm %s2341_s0, 12288 }
  0x16   : > { %s1965_s27 = scalar_lea.hbm %s2341_s0, %s1398_s14 }
  0x17   : > { %s1762_s29 = scalar_lea.hbm %s1965_s27, 3072  ;;  %p1768_p2 = scmp.lt.u32.totalorder %s1965_s27, %s2341_s0 }
  0x18   : > { %p1763_p12 = scmp.ne.s32.totalorder %s1965_s27, %s1762_s29  ;;  %p1769_p3 = scmp.lt.u32.totalorder %s1767_s9, %s1762_s29 }
  0x19   : > { %p1771_p5 = scmp.lt.u32.totalorder %s1762_s29, %s1965_s27 }
  0x1a   : > { %p1765_p0 = pnand %p1764_p13, %p1763_p12  ;;  %p1770_p4 = por %p1769_p3, %p1768_p2 }
  0x1c   : > { %p1766_p1 = pneg %p1765_p0  ;;  %p1772_p6 = por %p1771_p5, %p1770_p4 }
  0x1e   : > { %p1773_p8 = pnand %p1772_p6, %p1766_p1 }
  0x20   : > { %1776 = shalt.err (!%p1773_p8)
}
  0x21   : > { %s1777_s5 = scalar_lea.vmem %s1960_s12, 3072  ;;  %s1860_s13 = smov [#allocation2]  }
  0x22   : > { %p1778_p9 = scmp.ne.s32.totalorder %s1960_s12, %s1777_s5  ;;  %s1782_s14 = sshll.u32 %s1860_s13, 4  ;;  %s1783_s14 = int_to_ptr.vmem [resolvable:$false] %s1782_s14 }
  0x23   : > { %s1784_s15 = scalar_lea.vmem %s1783_s14, 6144  ;;  %p1785_p11 = scmp.lt.s32.totalorder %s1960_s12, %s1783_s14 }
  0x24   : > { %p1780_p12 = pnand %p1778_p9, %p1764_p13  ;;  %p1786_p2 = scmp.lt.s32.totalorder %s1784_s15, %s1777_s5 }
  0x26   : > { %p1781_p0 = pneg %p1780_p12  ;;  %p1787_p3 = por %p1786_p2, %p1785_p11 }
  0x28   : > { %p1788_p4 = pnand %p1787_p3, %p1781_p0 }
  0x2a   : > { %1791 = shalt.err (!%p1788_p4)
}
  0x2b   : > { %s1861_s23 = smov 192   ;;  %s1862_s29 = smov 12  }
  0x2c   : > { %1588 = dma.hbm_to_vmem [thread:$0]  (!%p1951_p10), %s1965_s27, 3072, %s1960_s12, %s1968_s26, %s1861_s23, %s1861_s23, %s1862_s29  }
  0x2d   : > { %p206_p13 = scmp.lt.s32.totalorder %s1858_s22, 5  ;;  %p2348_p1 = scmp.ge.s32.totalorder %s1858_s22, 1 }
  0x2f   : > { %p207_p5 = pnand %p2348_p1, %p206_p13 }
  0x30   : > { %s212_s30 = sand.u32 (!%p207_p5), 1, %s1834_s16  }
  0x31   : > { %210 = sbr.rel (%p207_p5) target bundleno = 512 (0x200), region = 28  ;;  %s213_s9 = scalar_lea.sflag (!%p207_p5), [#allocation3], %s212_s30 }
  0x32   : > { %s1582_s6 = smul.u32 (!%p207_p5), 192, %s212_s30 }
  0x34   : > { %s2000_s10 = scalar_lea.vmem (!%p207_p5), [#allocation2], %s1582_s6 }
  0x38   : > { %1825 = dma.done.wait (%p1943_p7), %s213_s9, 3072  }
  0x39   : > { %1827 = vsyncadd (%p1943_p7), %s213_s9, 4294964224  ;;  %v1863_v0 = vmov 0   ;;  %v1658_v1 = vld [vmem:[%s2342_s1 + $0x4] ss:$8 sps:$4 sm:$0xff]   ;;  %v1660_v2 = vld [vmem:[%s2342_s1] ss:$8 sps:$4 sm:$0xff]  }
  0x3a   : > { %888 = vmatprep.mubr.bf16.mxu0 %v1863_v0  ;;  %743 = vmatprep.subr.bf16.mxu1 %v1658_v1  ;;  %v1661_v3 = vld [vmem:[%s2342_s1 + $0x14] ss:$8 sps:$4 sm:$0xff]   ;;  %v1663_v4 = vld [vmem:[%s2342_s1 + $0x10] ss:$8 sps:$4 sm:$0xff]   ;;  %v1664_v5 = vld [vmem:[%s2342_s1 + $0x24] ss:$8 sps:$4 sm:$0xff]  }
  0x3b   : > { %744 = vmatpush1.bf16.msra.mxu1 %v1660_v2  ;;  %v1666_v6 = vld [vmem:[%s2342_s1 + $0x20] ss:$8 sps:$4 sm:$0xff]   ;;  %v1667_v7 = vld [vmem:[%s2342_s1 + $0x34] ss:$8 sps:$4 sm:$0xff]   ;;  %v1669_v8 = vld [vmem:[%s2342_s1 + $0x30] ss:$8 sps:$4 sm:$0xff]  }
  0x3c   : > { %745 = vmatprep.subr.bf16.mxu1 %v1661_v3  ;;  %v1682_v9 = vld [vmem:[%s2342_s1 + $0x104] ss:$8 sps:$4 sm:$0xff]   ;;  %v1684_v10 = vld [vmem:[%s2342_s1 + $0x100] ss:$8 sps:$4 sm:$0xff]   ;;  %v1688_v12 = vld [vmem:[%s2342_s1 + $0x114] ss:$8 sps:$4 sm:$0xff]  }
  0x3d   : > { %v1670_v11 = vld [vmem:[%s2342_s1 + $0x44] ss:$8 sps:$4 sm:$0xff]   ;;  %856 = vmatprep.subr.bf16.mxu0 %v1682_v9  ;;  %v1690_v13 = vld [vmem:[%s2342_s1 + $0x110] ss:$8 sps:$4 sm:$0xff]   ;;  %v1672_v14 = vld [vmem:[%s2342_s1 + $0x40] ss:$8 sps:$4 sm:$0xff]  }
  0x3e   : > { %857 = vmatpush1.bf16.msra.mxu0 %v1684_v10  ;;  %v1673_v15 = vld [vmem:[%s2342_s1 + $0x54] ss:$8 sps:$4 sm:$0xff]   ;;  %v1694_v16 = vld [vmem:[%s2342_s1 + $0x124] ss:$8 sps:$4 sm:$0xff]   ;;  %v1696_v17 = vld [vmem:[%s2342_s1 + $0x120] ss:$8 sps:$4 sm:$0xff]  }
  0x3f   : > { %746 = vmatpush1.bf16.msra.mxu1 %v1663_v4  ;;  %858 = vmatprep.subr.bf16.mxu0 %v1688_v12  ;;  %v1675_v18 = vld [vmem:[%s2342_s1 + $0x50] ss:$8 sps:$4 sm:$0xff]   ;;  %v1700_v19 = vld [vmem:[%s2342_s1 + $0x134] ss:$8 sps:$4 sm:$0xff]   ;;  %v1676_v20 = vld [vmem:[%s2342_s1 + $0x64] ss:$8 sps:$4 sm:$0xff]  }
  0x40   : > { %747 = vmatprep.subr.bf16.mxu1 %v1664_v5  ;;  %v1702_v21 = vld [vmem:[%s2342_s1 + $0x130] ss:$8 sps:$4 sm:$0xff]   ;;  %v1678_v22 = vld [vmem:[%s2342_s1 + $0x60] ss:$8 sps:$4 sm:$0xff]   ;;  %v1706_v23 = vld [vmem:[%s2342_s1 + $0x144] ss:$8 sps:$4 sm:$0xff]  }
  0x41   : > { %v1679_v24 = vld [vmem:[%s2342_s1 + $0x74] ss:$8 sps:$4 sm:$0xff]   ;;  %v1708_v25 = vld [vmem:[%s2342_s1 + $0x140] ss:$8 sps:$4 sm:$0xff]   ;;  %v1681_v26 = vld [vmem:[%s2342_s1 + $0x70] ss:$8 sps:$4 sm:$0xff]  }
  0x42   : > { %859 = vmatpush1.bf16.msra.mxu0 %v1690_v13  ;;  %v1712_v27 = vld [vmem:[%s2342_s1 + $0x154] ss:$8 sps:$4 sm:$0xff]   ;;  %v1685_v28 = vld [vmem:[%s2342_s1 + $0x84] ss:$8 sps:$4 sm:$0xff]   ;;  %v1714_v29 = vld [vmem:[%s2342_s1 + $0x150] ss:$8 sps:$4 sm:$0xff]  }
  0x43   : > { %748 = vmatpush1.bf16.msra.mxu1 %v1666_v6  ;;  %860 = vmatprep.subr.bf16.mxu0 %v1694_v16  ;;  %v1687_v30 = vld [vmem:[%s2342_s1 + $0x80] ss:$8 sps:$4 sm:$0xff]   ;;  %v1718_v31 = vld [vmem:[%s2342_s1 + $0x164] ss:$8 sps:$4 sm:$0xff]   ;;  %v1691_v32 = vld [vmem:[%s2342_s1 + $0x94] ss:$8 sps:$4 sm:$0xff]  }
  0x44   : > { %749 = vmatprep.subr.bf16.mxu1 %v1667_v7  ;;  %v1693_v33 = vld [vmem:[%s2342_s1 + $0x90] ss:$8 sps:$4 sm:$0xff]   ;;  %v1720_v34 = vld [vmem:[%s2342_s1 + $0x160] ss:$8 sps:$4 sm:$0xff]   ;;  %v1724_v36 = vld [vmem:[%s2342_s1 + $0x174] ss:$8 sps:$4 sm:$0xff]  }
  0x45   : > { %v1733_v35 = vld [vmem:[%s2000_s10 + $0x4] ss:$12 sps:$4 sm:$0xff]   ;;  %v1699_v39 = vld [vmem:[%s2342_s1 + $0xa0] ss:$8 sps:$4 sm:$0xff]   ;;  %v1703_v40 = vld [vmem:[%s2342_s1 + $0xb4] ss:$8 sps:$4 sm:$0xff]  }
  0x46   : > { %861 = vmatpush1.bf16.msra.mxu0 %v1696_v17  ;;  %v1697_v37 = vld [vmem:[%s2342_s1 + $0xa4] ss:$8 sps:$4 sm:$0xff]   ;;  %775 = vmatprep.mubr.bf16.mxu1 %v1733_v35  ;;  %v1726_v38 = vld [vmem:[%s2342_s1 + $0x170] ss:$8 sps:$4 sm:$0xff]   ;;  %v1730_v41 = vld [vmem:[%s2000_s10 + $0x8] ss:$12 sps:$4 sm:$0xff]  }
  0x47   : > { %750 = vmatpush1.bf16.msra.mxu1 %v1669_v8  ;;  %862 = vmatprep.subr.bf16.mxu0 %v1700_v19  ;;  %v1705_v42 = vld [vmem:[%s2342_s1 + $0xb0] ss:$8 sps:$4 sm:$0xff]   ;;  %v1709_v43 = vld [vmem:[%s2342_s1 + $0xc4] ss:$8 sps:$4 sm:$0xff]   ;;  %v1711_v44 = vld [vmem:[%s2342_s1 + $0xc0] ss:$8 sps:$4 sm:$0xff]  }
  0x48   : > { %751 = vmatprep.subr.bf16.mxu1 %v1670_v11  ;;  %v1715_v45 = vld [vmem:[%s2342_s1 + $0xd4] ss:$8 sps:$4 sm:$0xff]   ;;  %v1734_v46 = vld [vmem:[%s2000_s10 + $0x20] ss:$12 sps:$4 sm:$0xff]   ;;  %v1717_v47 = vld [vmem:[%s2342_s1 + $0xd0] ss:$8 sps:$4 sm:$0xff]  }
  0x49   : > { %v1721_v48 = vld [vmem:[%s2342_s1 + $0xe4] ss:$8 sps:$4 sm:$0xff]   ;;  %v1723_v49 = vld [vmem:[%s2342_s1 + $0xe0] ss:$8 sps:$4 sm:$0xff]   ;;  %v1727_v50 = vld [vmem:[%s2342_s1 + $0xf4] ss:$8 sps:$4 sm:$0xff]  }
  0x4a   : > { %863 = vmatpush1.bf16.msra.mxu0 %v1702_v21  ;;  %v1738_v51 = vld [vmem:[%s2000_s10 + $0x38] ss:$12 sps:$4 sm:$0xff]   ;;  %v1731_v53 = vld [vmem:[%s2000_s10] ss:$12 sps:$4 sm:$0xff]   ;;  %v1735_v54 = vld [vmem:[%s2000_s10 + $0x1c] ss:$12 sps:$4 sm:$0xff]  }
  0x4b   : > { %752 = vmatpush1.bf16.msra.mxu1 %v1672_v14  ;;  %864 = vmatprep.subr.bf16.mxu0 %v1706_v23  ;;  %v1729_v52 = vld [vmem:[%s2342_s1 + $0xf0] ss:$8 sps:$4 sm:$0xff]   ;;  %v1739_v57 = vld [vmem:[%s2000_s10 + $0x34] ss:$12 sps:$4 sm:$0xff]   ;;  %v1751_v3 = vld [vmem:[%s2000_s10 + $0x7c] ss:$12 sps:$4 sm:$0xff]  }
  0x4c   : > { %753 = vmatprep.subr.bf16.mxu1 %v1673_v15  ;;  %v1742_v55 = vld [vmem:[%s2000_s10 + $0x50] ss:$12 sps:$4 sm:$0xff]   ;;  %v1737_v56 = vld [vmem:[%s2000_s10 + $0x18] ss:$12 sps:$4 sm:$0xff]   ;;  %v1746_v58 = vld [vmem:[%s2000_s10 + $0x68] ss:$12 sps:$4 sm:$0xff]  }
  0x4d   : > { %v1741_v59 = vld [vmem:[%s2000_s10 + $0x30] ss:$12 sps:$4 sm:$0xff]   ;;  %v1743_v60 = vld [vmem:[%s2000_s10 + $0x4c] ss:$12 sps:$4 sm:$0xff]   ;;  %v1745_v62 = vld [vmem:[%s2000_s10 + $0x48] ss:$12 sps:$4 sm:$0xff]  }
  0x4e   : > { %865 = vmatpush1.bf16.msra.mxu0 %v1708_v25  ;;  %v1750_v61 = vld [vmem:[%s2000_s10 + $0x80] ss:$12 sps:$4 sm:$0xff]   ;;  %v1747_v63 = vld [vmem:[%s2000_s10 + $0x64] ss:$12 sps:$4 sm:$0xff]   ;;  %v1761_v9 = vld [vmem:[%s2000_s10 + $0xa8] ss:$12 sps:$4 sm:$0xff]  }
  0x4f   : > { %754 = vmatpush1.bf16.msra.mxu1 %v1675_v18  ;;  %866 = vmatprep.subr.bf16.mxu0 %v1712_v27  ;;  %v1754_v1 = vld [vmem:[%s2000_s10 + $0x98] ss:$12 sps:$4 sm:$0xff]   ;;  %v1749_v2 = vld [vmem:[%s2000_s10 + $0x60] ss:$12 sps:$4 sm:$0xff]   ;;  %v1758_v4 = vld [vmem:[%s2000_s10 + $0xb0] ss:$12 sps:$4 sm:$0xff]  }
  0x50   : > { %755 = vmatprep.subr.bf16.mxu1 %v1676_v20  ;;  %v1753_v5 = vld [vmem:[%s2000_s10 + $0x78] ss:$12 sps:$4 sm:$0xff]   ;;  %v1755_v6 = vld [vmem:[%s2000_s10 + $0x94] ss:$12 sps:$4 sm:$0xff]   ;;  %v1757_v7 = vld [vmem:[%s2000_s10 + $0x90] ss:$12 sps:$4 sm:$0xff]  }
  0x51   : > { %v1759_v8 = vld [vmem:[%s2000_s10 + $0xac] ss:$12 sps:$4 sm:$0xff]   ;;  %s1400_s13 = sshll.u32 %s1842_s18, 4  ;;  %p265_p7 = scmp.lt.s32.totalorder %s1846_s19, 1  ;;  %vm1033_vm0 = vcmask 519168  }
  0x52   : > { %867 = vmatpush1.bf16.msra.mxu0 %v1714_v29  ;;  %p267_p10 = scmp.lt.s32.totalorder %s1400_s13, 31  ;;  %s1864_s6 = smov 64  }
  0x53   : > { %756 = vmatpush1.bf16.msra.mxu1 %v1678_v22  ;;  %868 = vmatprep.subr.bf16.mxu0 %v1718_v31  ;;  %s2363_s19 = smov (!%p265_p7, %s1846_s19), 1 }
  0x54   : > { %757 = vmatprep.subr.bf16.mxu1 %v1679_v24  ;;  %s2365_s13 = smov (!%p267_p10, %s1400_s13), 31  ;;  %s1401_s28 = sshll.u32 %s2363_s19, 5 }
  0x55   : > { %s270_s14 = sadd.s32 %s1401_s28, %s2365_s13 }
  0x56   : > { %869 = vmatpush1.bf16.msra.mxu0 %v1720_v34  ;;  %s2185_s10 = sshll.u32 %s270_s14, 2 }
  0x57   : > { %758 = vmatpush1.bf16.msra.mxu1 %v1681_v26  ;;  %870 = vmatprep.subr.bf16.mxu0 %v1724_v36  ;;  %s2191_s23 = scalar_lea.vmem %s2343_s2, %s2185_s10  ;;  %s2197_s30 = scalar_lea.vmem %s2345_s4, %s2185_s10 }
  0x58   : > { %759 = vmatprep.subr.bf16.mxu1 %v1685_v28  ;;  %s2283_s12 = scalar_lea.vmem %s2344_s3, %s2185_s10 }
  0x5a   : > { %871 = vmatpush1.bf16.msra.mxu0 %v1726_v38 }
  0x5b   : > { %760 = vmatpush1.bf16.msra.mxu1 %v1687_v30 }
  0x5c   : > { %761 = vmatprep.subr.bf16.mxu1 %v1691_v32 }
  0x5d   : > { %889 = vmatmul.mubr.bf16.vlgmr.msra.gmra.mrb[0].mxu0 %v1730_v41 }
  0x5e   : > { %898 = vmatprep.mubr.bf16.mxu0 %v1863_v0 }
  0x5f   : > { %762 = vmatpush1.bf16.msra.mxu1 %v1693_v33 }
  0x60   : > { %763 = vmatprep.subr.bf16.mxu1 %v1697_v37 }
  0x63   : > { %764 = vmatpush1.bf16.msra.mxu1 %v1699_v39 }
  0x64   : > { %765 = vmatprep.subr.bf16.mxu1 %v1703_v40 }
  0x65   : > { %899 = vmatmul.mubr.bf16.gmra.mrb[4].mxu0 %v1734_v46 }
  0x66   : > { %908 = vmatprep.mubr.bf16.mxu0 %v1863_v0 }
  0x67   : > { %766 = vmatpush1.bf16.msra.mxu1 %v1705_v42 }
  0x68   : > { %767 = vmatprep.subr.bf16.mxu1 %v1709_v43 }
  0x6b   : > { %768 = vmatpush1.bf16.msra.mxu1 %v1711_v44 }
  0x6c   : > { %769 = vmatprep.subr.bf16.mxu1 %v1715_v45 }
  0x6d   : > { %909 = vmatmul.mubr.bf16.gmra.mrb[8].mxu0 %v1738_v51 }
  0x6e   : > { %918 = vmatprep.mubr.bf16.mxu0 %v1863_v0 }
  0x6f   : > { %770 = vmatpush1.bf16.msra.mxu1 %v1717_v47 }
  0x70   : > { %771 = vmatprep.subr.bf16.mxu1 %v1721_v48 }
  0x73   : > { %772 = vmatpush1.bf16.msra.mxu1 %v1723_v49 }
  0x74   : > { %773 = vmatprep.subr.bf16.mxu1 %v1727_v50 }
  0x75   : > { %919 = vmatmul.mubr.bf16.gmra.mrb[12].mxu0 %v1742_v55 }
  0x76   : > { %928 = vmatprep.mubr.bf16.mxu0 %v1863_v0 }
  0x77   : > { %774 = vmatpush1.bf16.msra.mxu1 %v1729_v52 }
  0x7a   : > { %776 = vmatmul.mubr.bf16.vlgmr.msra.gmra.mrb[0].mxu1 %v1731_v53 }
  0x7b   : > { %785 = vmatprep.mubr.bf16.mxu1 %v1735_v54 }
  0x7d   : > { %929 = vmatmul.mubr.bf16.gmra.mrb[16].mxu0 %v1746_v58 }
  0x7e   : > { %938 = vmatprep.mubr.bf16.mxu0 %v1863_v0 }
  0x82   : > { %786 = vmatmul.mubr.bf16.gmra.mrb[4].mxu1 %v1737_v56 }
  0x83   : > { %795 = vmatprep.mubr.bf16.mxu1 %v1739_v57 }
  0x85   : > { %939 = vmatmul.mubr.bf16.gmra.mrb[20].mxu0 %v1750_v61 }
  0x86   : > { %948 = vmatprep.mubr.bf16.mxu0 %v1863_v0 }
  0x8a   : > { %796 = vmatmul.mubr.bf16.gmra.mrb[8].mxu1 %v1741_v59 }
  0x8b   : > { %805 = vmatprep.mubr.bf16.mxu1 %v1743_v60 }
  0x8d   : > { %949 = vmatmul.mubr.bf16.gmra.mrb[24].mxu0 %v1754_v1 }
  0x8e   : > { %958 = vmatprep.mubr.bf16.mxu0 %v1863_v0 }
  0x92   : > { %806 = vmatmul.mubr.bf16.gmra.mrb[12].mxu1 %v1745_v62 }
  0x93   : > { %815 = vmatprep.mubr.bf16.mxu1 %v1747_v63 }
  0x95   : > { %959 = vmatmul.mubr.bf16.gmra.mrb[28].mxu0 %v1758_v4 }
  0x9a   : > { %816 = vmatmul.mubr.bf16.gmra.mrb[16].mxu1 %v1749_v2 }
  0x9b   : > { %825 = vmatprep.mubr.bf16.mxu1 %v1751_v3 }
  0xa2   : > { %826 = vmatmul.mubr.bf16.gmra.mrb[20].mxu1 %v1753_v5 }
  0xa3   : > { %835 = vmatprep.mubr.bf16.mxu1 %v1755_v6 }
  0xaa   : > { %836 = vmatmul.mubr.bf16.gmra.mrb[24].mxu1 %v1757_v7 }
  0xab   : > { %845 = vmatprep.mubr.bf16.mxu1 %v1759_v8 }
  0xb2   : > { %846 = vmatmul.mubr.bf16.gmra.mrb[28].mxu1 %v1761_v9 }
 0x130   : > { %v890_v10 = vpop.f32.mrb[0].mxu0 }
 0x131   : > { %v892_v0 = vpop.f32.mrb[1].mxu0 }
 0x132   : > { %v894_v11 = vpop.f32.mrb[2].mxu0 }
 0x133   : > { %v896_v12 = vpop.f32.mrb[3].mxu0 }
 0x138   : > { %v900_v13 = vpop.f32.mrb[4].mxu0 }
 0x139   : > { %v902_v14 = vpop.f32.mrb[5].mxu0 }
 0x13a   : > { %v904_v15 = vpop.f32.mrb[6].mxu0 }
 0x13b   : > { %v906_v16 = vpop.f32.mrb[7].mxu0 }
 0x140   : > { %v910_v17 = vpop.f32.mrb[8].mxu0 }
 0x141   : > { %v912_v18 = vpop.f32.mrb[9].mxu0 }
 0x142   : > { %v914_v19 = vpop.f32.mrb[10].mxu0 }
 0x143   : > { %v916_v20 = vpop.f32.mrb[11].mxu0 }
 0x148   : > { %v920_v29 = vpop.f32.mrb[12].mxu0 }
 0x149   : > { %v922_v32 = vpop.f32.mrb[13].mxu0 }
 0x14a   : > { %v924_v34 = vpop.f32.mrb[14].mxu0 }
 0x14b   : > { %v926_v36 = vpop.f32.mrb[15].mxu0 }
 0x14d   : > { %v777_v21 = vpop.f32.mrb[0].mxu1 }
 0x14e   : > { %v891_v22 = vadd.f32 %v890_v10, %v777_v21  ;;  %v779_v23 = vpop.f32.mrb[1].mxu1 }
 0x14f   : > { %v893_v24 = vadd.f32 %v892_v0, %v779_v23  ;;  %v781_v25 = vpop.f32.mrb[2].mxu1 }
 0x150   : > { %v1515_v26 = vpack.c.bf16 %v891_v22, %v891_v22  ;;  %v895_v27 = vadd.f32 %v894_v11, %v781_v25  ;;  %v783_v28 = vpop.f32.mrb[3].mxu1  ;;  %v930_v45 = vpop.f32.mrb[16].mxu0 }
 0x151   : > { %v1531_v30 = vpack.c.bf16 %v893_v24, %v893_v24  ;;  %v897_v31 = vadd.f32 %v896_v12, %v783_v28  ;;  %v932_v48 = vpop.f32.mrb[17].mxu0 }
 0x152   : > { %1034 = vst.msk [vmem:[%s2191_s23] sm:$0xf] %vm1033_vm0, %v1515_v26  ;;  %v1516_v33 = vpack.c.bf16 %v895_v27, %v895_v27  ;;  %1050 = vrot.lane.b32.xlu0 %v1515_v26, %s1864_s6  ;;  %v934_v50 = vpop.f32.mrb[18].mxu0 }
 0x153   : > { %1178 = vst.msk [vmem:[%s2197_s30] sm:$0xf] %vm1033_vm0, %v1531_v30  ;;  %v1532_v35 = vpack.c.bf16 %v897_v31, %v897_v31  ;;  %v936_v52 = vpop.f32.mrb[19].mxu0 }
 0x154   : > { %1035 = vst.msk [vmem:[%s2191_s23 + $0x4] sm:$0xf] %vm1033_vm0, %v1516_v33 }
 0x155   : > { %1179 = vst.msk [vmem:[%s2197_s30 + $0x4] sm:$0xf] %vm1033_vm0, %v1532_v35  ;;  %v787_v37 = vpop.f32.mrb[4].mxu1 }
 0x156   : > { %v901_v38 = vadd.f32 %v900_v13, %v787_v37  ;;  %1052 = vrot.lane.b32.xlu0 %v1516_v33, %s1864_s6  ;;  %v789_v39 = vpop.f32.mrb[5].mxu1 }
 0x157   : > { %v903_v40 = vadd.f32 %v902_v14, %v789_v39  ;;  %v791_v41 = vpop.f32.mrb[6].mxu1 }
 0x158   : > { %v1517_v42 = vpack.c.bf16 %v901_v38, %v901_v38  ;;  %v905_v43 = vadd.f32 %v904_v15, %v791_v41  ;;  %v793_v44 = vpop.f32.mrb[7].mxu1  ;;  %v940_v61 = vpop.f32.mrb[20].mxu0 }
 0x159   : > { %v1533_v46 = vpack.c.bf16 %v903_v40, %v903_v40  ;;  %v907_v47 = vadd.f32 %v906_v16, %v793_v44  ;;  %v942_v1 = vpop.f32.mrb[21].mxu0 }
 0x15a   : > { %1036 = vst.msk [vmem:[%s2191_s23 + $0x8] sm:$0xf] %vm1033_vm0, %v1517_v42  ;;  %v1518_v49 = vpack.c.bf16 %v905_v43, %v905_v43  ;;  %1054 = vrot.lane.b32.xlu1 %v1517_v42, %s1864_s6  ;;  %v944_v3 = vpop.f32.mrb[22].mxu0 }
 0x15b   : > { %1180 = vst.msk [vmem:[%s2197_s30 + $0x8] sm:$0xf] %vm1033_vm0, %v1533_v46  ;;  %v1534_v51 = vpack.c.bf16 %v907_v47, %v907_v47  ;;  %v946_v5 = vpop.f32.mrb[23].mxu0 }
 0x15c   : > { %1037 = vst.msk [vmem:[%s2191_s23 + $0xc] sm:$0xf] %vm1033_vm0, %v1518_v49 }
 0x15d   : > { %1181 = vst.msk [vmem:[%s2197_s30 + $0xc] sm:$0xf] %vm1033_vm0, %v1534_v51  ;;  %v797_v53 = vpop.f32.mrb[8].mxu1 }
 0x15e   : > { %v911_v54 = vadd.f32 %v910_v17, %v797_v53  ;;  %1056 = vrot.lane.b32.xlu1 %v1518_v49, %s1864_s6  ;;  %v799_v55 = vpop.f32.mrb[9].mxu1 }
 0x15f   : > { %v913_v56 = vadd.f32 %v912_v18, %v799_v55  ;;  %v801_v57 = vpop.f32.mrb[10].mxu1 }
 0x160   : > { %v1519_v58 = vpack.c.bf16 %v911_v54, %v911_v54  ;;  %v915_v59 = vadd.f32 %v914_v19, %v801_v57  ;;  %v803_v60 = vpop.f32.mrb[11].mxu1  ;;  %v950_v13 = vpop.f32.mrb[24].mxu0 }
 0x161   : > { %v1535_v62 = vpack.c.bf16 %v913_v56, %v913_v56  ;;  %v917_v63 = vadd.f32 %v916_v20, %v803_v60  ;;  %v952_v16 = vpop.f32.mrb[25].mxu0 }
 0x162   : > { %1038 = vst.msk [vmem:[%s2191_s23 + $0x10] sm:$0xf] %vm1033_vm0, %v1519_v58  ;;  %v1520_v2 = vpack.c.bf16 %v915_v59, %v915_v59  ;;  %1058 = vrot.lane.b32.xlu0 %v1519_v58, %s1864_s6  ;;  %v954_v18 = vpop.f32.mrb[26].mxu0 }
 0x163   : > { %1182 = vst.msk [vmem:[%s2197_s30 + $0x10] sm:$0xf] %vm1033_vm0, %v1535_v62  ;;  %v1536_v4 = vpack.c.bf16 %v917_v63, %v917_v63  ;;  %v956_v20 = vpop.f32.mrb[27].mxu0 }
 0x164   : > { %1039 = vst.msk [vmem:[%s2191_s23 + $0x14] sm:$0xf] %vm1033_vm0, %v1520_v2  ;;  %1060 = vrot.lane.b32.xlu1 %v1520_v2, %s1864_s6 }
 0x165   : > { %1183 = vst.msk [vmem:[%s2197_s30 + $0x14] sm:$0xf] %vm1033_vm0, %v1536_v4  ;;  %v807_v6 = vpop.f32.mrb[12].mxu1 }
 0x166   : > { %v921_v7 = vadd.f32 %v920_v29, %v807_v6  ;;  %v809_v8 = vpop.f32.mrb[13].mxu1 }
 0x167   : > { %v923_v9 = vadd.f32 %v922_v32, %v809_v8  ;;  %v811_v10 = vpop.f32.mrb[14].mxu1 }
 0x168   : > { %v1521_v0 = vpack.c.bf16 %v921_v7, %v921_v7  ;;  %v925_v11 = vadd.f32 %v924_v34, %v811_v10  ;;  %v813_v12 = vpop.f32.mrb[15].mxu1  ;;  %v960_v29 = vpop.f32.mrb[28].mxu0 }
 0x169   : > { %v1537_v14 = vpack.c.bf16 %v923_v9, %v923_v9  ;;  %v927_v15 = vadd.f32 %v926_v36, %v813_v12  ;;  %v962_v32 = vpop.f32.mrb[29].mxu0 }
 0x16a   : > { %1040 = vst.msk [vmem:[%s2191_s23 + $0x18] sm:$0xf] %vm1033_vm0, %v1521_v0  ;;  %v1522_v17 = vpack.c.bf16 %v925_v11, %v925_v11  ;;  %1062 = vrot.lane.b32.xlu0 %v1521_v0, %s1864_s6  ;;  %v964_v34 = vpop.f32.mrb[30].mxu0 }
 0x16b   : > { %1184 = vst.msk [vmem:[%s2197_s30 + $0x18] sm:$0xf] %vm1033_vm0, %v1537_v14  ;;  %v1538_v19 = vpack.c.bf16 %v927_v15, %v927_v15  ;;  %v966_v36 = vpop.f32.mrb[31].mxu0 }
 0x16c   : > { %1041 = vst.msk [vmem:[%s2191_s23 + $0x1c] sm:$0xf] %vm1033_vm0, %v1522_v17  ;;  %1064 = vrot.lane.b32.xlu1 %v1522_v17, %s1864_s6 }
 0x16d   : > { %1185 = vst.msk [vmem:[%s2197_s30 + $0x1c] sm:$0xf] %vm1033_vm0, %v1538_v19  ;;  %v817_v21 = vpop.f32.mrb[16].mxu1 }
 0x16e   : > { %v931_v22 = vadd.f32 %v930_v45, %v817_v21  ;;  %v819_v23 = vpop.f32.mrb[17].mxu1 }
 0x16f   : > { %v933_v24 = vadd.f32 %v932_v48, %v819_v23  ;;  %v821_v25 = vpop.f32.mrb[18].mxu1 }
 0x170   : > { %v1523_v26 = vpack.c.bf16 %v931_v22, %v931_v22  ;;  %v935_v27 = vadd.f32 %v934_v50, %v821_v25  ;;  %v823_v28 = vpop.f32.mrb[19].mxu1 }
 0x171   : > { %v1539_v30 = vpack.c.bf16 %v933_v24, %v933_v24  ;;  %v937_v31 = vadd.f32 %v936_v52, %v823_v28 }
 0x172   : > { %1042 = vst.msk [vmem:[%s2191_s23 + $0x20] sm:$0xf] %vm1033_vm0, %v1523_v26  ;;  %v1524_v33 = vpack.c.bf16 %v935_v27, %v935_v27  ;;  %1066 = vrot.lane.b32.xlu0 %v1523_v26, %s1864_s6 }
 0x173   : > { %1186 = vst.msk [vmem:[%s2197_s30 + $0x20] sm:$0xf] %vm1033_vm0, %v1539_v30  ;;  %v1540_v35 = vpack.c.bf16 %v937_v31, %v937_v31 }
 0x174   : > { %1043 = vst.msk [vmem:[%s2191_s23 + $0x24] sm:$0xf] %vm1033_vm0, %v1524_v33  ;;  %1068 = vrot.lane.b32.xlu1 %v1524_v33, %s1864_s6 }
 0x175   : > { %1187 = vst.msk [vmem:[%s2197_s30 + $0x24] sm:$0xf] %vm1033_vm0, %v1540_v35  ;;  %v827_v37 = vpop.f32.mrb[20].mxu1 }
 0x176   : > { %v941_v38 = vadd.f32 %v940_v61, %v827_v37  ;;  %v829_v39 = vpop.f32.mrb[21].mxu1 }
 0x177   : > { %v943_v40 = vadd.f32 %v942_v1, %v829_v39  ;;  %v831_v41 = vpop.f32.mrb[22].mxu1 }
 0x178   : > { %v1525_v42 = vpack.c.bf16 %v941_v38, %v941_v38  ;;  %v945_v43 = vadd.f32 %v944_v3, %v831_v41  ;;  %v833_v44 = vpop.f32.mrb[23].mxu1 }
 0x179   : > { %v1541_v45 = vpack.c.bf16 %v943_v40, %v943_v40  ;;  %v947_v46 = vadd.f32 %v946_v5, %v833_v44 }
 0x17a   : > { %1044 = vst.msk [vmem:[%s2191_s23 + $0x28] sm:$0xf] %vm1033_vm0, %v1525_v42  ;;  %v1526_v47 = vpack.c.bf16 %v945_v43, %v945_v43  ;;  %1070 = vrot.lane.b32.xlu0 %v1525_v42, %s1864_s6 }
 0x17b   : > { %1188 = vst.msk [vmem:[%s2197_s30 + $0x28] sm:$0xf] %vm1033_vm0, %v1541_v45  ;;  %v1542_v48 = vpack.c.bf16 %v947_v46, %v947_v46 }
 0x17c   : > { %1045 = vst.msk [vmem:[%s2191_s23 + $0x2c] sm:$0xf] %vm1033_vm0, %v1526_v47  ;;  %1072 = vrot.lane.b32.xlu1 %v1526_v47, %s1864_s6 }
 0x17d   : > { %1189 = vst.msk [vmem:[%s2197_s30 + $0x2c] sm:$0xf] %vm1033_vm0, %v1542_v48  ;;  %v837_v49 = vpop.f32.mrb[24].mxu1 }
 0x17e   : > { %v951_v50 = vadd.f32 %v950_v13, %v837_v49  ;;  %v839_v51 = vpop.f32.mrb[25].mxu1 }
 0x17f   : > { %v953_v52 = vadd.f32 %v952_v16, %v839_v51  ;;  %v841_v53 = vpop.f32.mrb[26].mxu1 }
 0x180   : > { %v1527_v54 = vpack.c.bf16 %v951_v50, %v951_v50  ;;  %v955_v55 = vadd.f32 %v954_v18, %v841_v53  ;;  %v843_v56 = vpop.f32.mrb[27].mxu1 }
 0x181   : > { %v1543_v57 = vpack.c.bf16 %v953_v52, %v953_v52  ;;  %v957_v58 = vadd.f32 %v956_v20, %v843_v56 }
 0x182   : > { %1046 = vst.msk [vmem:[%s2191_s23 + $0x30] sm:$0xf] %vm1033_vm0, %v1527_v54  ;;  %v1528_v59 = vpack.c.bf16 %v955_v55, %v955_v55  ;;  %1074 = vrot.lane.b32.xlu0 %v1527_v54, %s1864_s6 }
 0x183   : > { %1190 = vst.msk [vmem:[%s2197_s30 + $0x30] sm:$0xf] %vm1033_vm0, %v1543_v57  ;;  %v1544_v60 = vpack.c.bf16 %v957_v58, %v957_v58 }
 0x184   : > { %1047 = vst.msk [vmem:[%s2191_s23 + $0x34] sm:$0xf] %vm1033_vm0, %v1528_v59  ;;  %1076 = vrot.lane.b32.xlu1 %v1528_v59, %s1864_s6 }
 0x185   : > { %1191 = vst.msk [vmem:[%s2197_s30 + $0x34] sm:$0xf] %vm1033_vm0, %v1544_v60  ;;  %v847_v61 = vpop.f32.mrb[28].mxu1 }
 0x186   : > { %v961_v62 = vadd.f32 %v960_v29, %v847_v61  ;;  %v849_v63 = vpop.f32.mrb[29].mxu1 }
 0x187   : > { %v963_v1 = vadd.f32 %v962_v32, %v849_v63  ;;  %v851_v2 = vpop.f32.mrb[30].mxu1 }
 0x188   : > { %v1529_v3 = vpack.c.bf16 %v961_v62, %v961_v62  ;;  %v965_v4 = vadd.f32 %v964_v34, %v851_v2  ;;  %v853_v5 = vpop.f32.mrb[31].mxu1 }
 0x189   : > { %v1545_v6 = vpack.c.bf16 %v963_v1, %v963_v1  ;;  %v967_v7 = vadd.f32 %v966_v36, %v853_v5 }
 0x18a   : > { %1048 = vst.msk [vmem:[%s2191_s23 + $0x38] sm:$0xf] %vm1033_vm0, %v1529_v3  ;;  %v1530_v8 = vpack.c.bf16 %v965_v4, %v965_v4  ;;  %1078 = vrot.lane.b32.xlu0 %v1529_v3, %s1864_s6 }
 0x18b   : > { %1192 = vst.msk [vmem:[%s2197_s30 + $0x38] sm:$0xf] %vm1033_vm0, %v1545_v6  ;;  %v1546_v9 = vpack.c.bf16 %v967_v7, %v967_v7 }
 0x18c   : > { %1049 = vst.msk [vmem:[%s2191_s23 + $0x3c] sm:$0xf] %vm1033_vm0, %v1530_v8  ;;  %1080 = vrot.lane.b32.xlu1 %v1530_v8, %s1864_s6 }
 0x18d   : > { %1193 = vst.msk [vmem:[%s2197_s30 + $0x3c] sm:$0xf] %vm1033_vm0, %v1546_v9 }
 0x1c4   : > { %v1051_v10 = vpop.permute.xlu0 %1050 }
 0x1c5   : > { %1098 = vst.msk [vmem:[%s2283_s12] sm:$0xf] %vm1033_vm0, %v1051_v10 }
 0x1c8   : > { %v1053_v0 = vpop.permute.xlu0 %1052 }
 0x1c9   : > { %1099 = vst.msk [vmem:[%s2283_s12 + $0x4] sm:$0xf] %vm1033_vm0, %v1053_v0 }
 0x1cc   : > { %v1055_v11 = vpop.permute.xlu1 %1054 }
 0x1cd   : > { %1100 = vst.msk [vmem:[%s2283_s12 + $0x8] sm:$0xf] %vm1033_vm0, %v1055_v11 }
 0x1d0   : > { %v1057_v12 = vpop.permute.xlu1 %1056 }
 0x1d1   : > { %1101 = vst.msk [vmem:[%s2283_s12 + $0xc] sm:$0xf] %vm1033_vm0, %v1057_v12 }
 0x1d4   : > { %v1059_v13 = vpop.permute.xlu0 %1058 }
 0x1d5   : > { %1102 = vst.msk [vmem:[%s2283_s12 + $0x10] sm:$0xf] %vm1033_vm0, %v1059_v13 }
 0x1d6   : > { %v1061_v14 = vpop.permute.xlu1 %1060 }
 0x1d7   : > { %1103 = vst.msk [vmem:[%s2283_s12 + $0x14] sm:$0xf] %vm1033_vm0, %v1061_v14 }
 0x1dc   : > { %v1063_v15 = vpop.permute.xlu0 %1062 }
 0x1dd   : > { %1104 = vst.msk [vmem:[%s2283_s12 + $0x18] sm:$0xf] %vm1033_vm0, %v1063_v15 }
 0x1de   : > { %v1065_v16 = vpop.permute.xlu1 %1064 }
 0x1df   : > { %1105 = vst.msk [vmem:[%s2283_s12 + $0x1c] sm:$0xf] %vm1033_vm0, %v1065_v16 }
 0x1e4   : > { %v1067_v17 = vpop.permute.xlu0 %1066 }
 0x1e5   : > { %1106 = vst.msk [vmem:[%s2283_s12 + $0x20] sm:$0xf] %vm1033_vm0, %v1067_v17 }
 0x1e6   : > { %v1069_v18 = vpop.permute.xlu1 %1068 }
 0x1e7   : > { %1107 = vst.msk [vmem:[%s2283_s12 + $0x24] sm:$0xf] %vm1033_vm0, %v1069_v18 }
 0x1ec   : > { %v1071_v19 = vpop.permute.xlu0 %1070 }
 0x1ed   : > { %1108 = vst.msk [vmem:[%s2283_s12 + $0x28] sm:$0xf] %vm1033_vm0, %v1071_v19 }
 0x1ee   : > { %v1073_v20 = vpop.permute.xlu1 %1072 }
 0x1ef   : > { %1109 = vst.msk [vmem:[%s2283_s12 + $0x2c] sm:$0xf] %vm1033_vm0, %v1073_v20 }
 0x1f4   : > { %v1075_v21 = vpop.permute.xlu0 %1074 }
 0x1f5   : > { %1110 = vst.msk [vmem:[%s2283_s12 + $0x30] sm:$0xf] %vm1033_vm0, %v1075_v21 }
 0x1f6   : > { %v1077_v22 = vpop.permute.xlu1 %1076 }
 0x1f7   : > { %1111 = vst.msk [vmem:[%s2283_s12 + $0x34] sm:$0xf] %vm1033_vm0, %v1077_v22 }
 0x1fc   : > { %v1079_v23 = vpop.permute.xlu0 %1078 }
 0x1fd   : > { %1112 = vst.msk [vmem:[%s2283_s12 + $0x38] sm:$0xf] %vm1033_vm0, %v1079_v23 }
 0x1fe   : > { %v1081_v24 = vpop.permute.xlu1 %1080 }
 0x1ff   : > { %1113 = vst.msk [vmem:[%s2283_s12 + $0x3c] sm:$0xf] %vm1033_vm0, %v1081_v24 }
 0x200 PF: > { %s18_s22 = sadd.s32 1, %s1858_s22   ;;  %s2349_s15 = smov %s1834_s16 }
 0x201   : > { %p15_p11 = scmp.ge.s32.totalorder %s18_s22, 6   ;;  %s2350_s16 = smov %s1838_s17 }
 0x202   : > { %s2351_s17 = smov %s1956_s8  ;;  %s2352_s18 = smov %s1850_s20 }
 0x203   : > { %s2353_s19 = smov %s1854_s21  ;;  %s2354_s20 = smov %s2357_s24 }
 0x204   : > { %s2355_s21 = smov %s2361_s25  ;;  %17 = sbr.rel (!%p15_p11) target bundleno = 5 (0x5), region = 92 }
 0x20b   :  { %1274 = vsyncpa [#allocation3], 1 }
 0x20c   :  { %1276 = vsyncpa [#allocation3 + $0x1], 1 }

</bundles_post_ra>
